<compile_context>
chip_gen: v6e
topology: v6e:2x2x1
jax: 0.10.0
libtpu: 0.0.40
codegen_flags: <defaults>
</compile_context>

<pallas_src>
import functools

import jax
import jax.numpy as jnp
from jax import lax
from jax.experimental import pallas as pl
from jax.experimental.pallas import tpu as pltpu


MASK_VALUE = -1e30  # finite large-negative mask (avoids -inf NaN paths)
VMEM_LIMIT = 64 * 1024 * 1024  # explicit scoped-VMEM budget (v7x-safe)


def _fit_tile(dim, pref, align):
    """Largest power-of-two tile <= pref that divides dim (>= align), else dim."""
    t = pref
    while t >= align:
        if dim % t == 0:
            return t
        t //= 2
    return dim


# ----------------------------- tiled linear ---------------------------------

def _linear_kernel(x_ref, w_ref, o_ref, acc_ref):
    @pl.when(pl.program_id(2) == 0)
    def _init():
        acc_ref[...] = jnp.zeros_like(acc_ref)

    acc_ref[...] += jnp.dot(x_ref[...], w_ref[...],
                            preferred_element_type=jnp.float32)

    @pl.when(pl.program_id(2) == pl.num_programs(2) - 1)
    def _store():
        o_ref[...] = acc_ref[...].astype(o_ref.dtype)


def linear(x2d, w_t, out_dtype):
    """y = x2d @ w_t, with w_t pre-transposed to (in_features, out_features)."""
    M, K = x2d.shape
    K2, N = w_t.shape
    assert K == K2
    tm = _fit_tile(M, 256, 8)
    tn = _fit_tile(N, 256, 128)
    tk = _fit_tile(K, 512, 128)
    grid = (M // tm, N // tn, K // tk)
    return pl.pallas_call(
        _linear_kernel,
        out_shape=jax.ShapeDtypeStruct((M, N), out_dtype),
        grid_spec=pltpu.PrefetchScalarGridSpec(
            num_scalar_prefetch=0,
            grid=grid,
            in_specs=[
                pl.BlockSpec((tm, tk), lambda i, j, k: (i, k)),
                pl.BlockSpec((tk, tn), lambda i, j, k: (k, j)),
            ],
            out_specs=pl.BlockSpec((tm, tn), lambda i, j, k: (i, j)),
            scratch_shapes=[pltpu.VMEM((tm, tn), jnp.float32)],
        ),
        compiler_params=pltpu.CompilerParams(
            dimension_semantics=("parallel", "parallel", "arbitrary"),
            vmem_limit_bytes=VMEM_LIMIT,
        ),
        cost_estimate=pl.CostEstimate(
            flops=2 * M * N * K,
            transcendentals=0,
            bytes_accessed=int((M * K + K * N) * x2d.dtype.itemsize
                               + M * N * jnp.dtype(out_dtype).itemsize),
        ),
    )(x2d, w_t)


# ----------------------- KV-tiled flash attention ---------------------------

def _flash_attn_kernel(q_ref, k_ref, v_ref, o_ref, m_scr, l_scr, acc_scr, *,
                       scale, causal, softcap, sliding_window,
                       num_q_heads, num_kv_heads, head_dim, q_tile, k_tile):
    # q_ref : [1, q_tile, Hq*D]   (bf16)
    # k_ref : [1, k_tile, Hkv*D]  v_ref : [1, k_tile, Hkv*D]
    # o_ref : [1, q_tile, Hq*D]   (lane-dense output)
    # scratch (f32): m_scr/l_scr [q_tile, Hq], acc_scr [q_tile, Hq*D]
    qi = pl.program_id(1)
    ki = pl.program_id(2)
    group = num_q_heads // num_kv_heads

    @pl.when(ki == 0)
    def _init():
        m_scr[...] = jnp.full_like(m_scr, -jnp.inf)
        l_scr[...] = jnp.zeros_like(l_scr)
        acc_scr[...] = jnp.zeros_like(acc_scr)

    def _process_tile():
        mask = None
        if causal or sliding_window > 0:
            q_pos = qi * q_tile + lax.broadcasted_iota(
                jnp.int32, (q_tile, k_tile), 0)
            k_pos = ki * k_tile + lax.broadcasted_iota(
                jnp.int32, (q_tile, k_tile), 1)
            if causal:
                mask = k_pos <= q_pos
            if sliding_window > 0:
                sw = (q_pos - k_pos) <= sliding_window
                mask = sw if mask is None else jnp.logical_and(mask, sw)

        for g in range(num_q_heads):                       # GQA handled in-kernel
            h = g // group
            q_h = q_ref[0, :, g * head_dim:(g + 1) * head_dim]   # [tq, D] bf16
            k_h = k_ref[0, :, h * head_dim:(h + 1) * head_dim]   # [tk, D] bf16
            v_h = v_ref[0, :, h * head_dim:(h + 1) * head_dim]   # [tk, D] bf16

            # q . k^T via dot_general (no explicit K transpose in VMEM).
            s = lax.dot_general(q_h, k_h, (((1,), (1,)), ((), ())),
                                preferred_element_type=jnp.float32)  # [tq, tk]
            s = s * scale
            if softcap > 0.0:
                s = softcap * jnp.tanh(s * (1.0 / softcap))
            if mask is not None:
                s = jnp.where(mask, s, MASK_VALUE)

            m_prev = m_scr[:, g:g + 1]                           # [tq, 1]
            l_prev = l_scr[:, g:g + 1]
            acc_prev = acc_scr[:, g * head_dim:(g + 1) * head_dim]

            m_cur = jnp.max(s, axis=-1, keepdims=True)
            m_new = jnp.maximum(m_prev, m_cur)
            alpha = jnp.exp(m_prev - m_new)
            p = jnp.exp(s - m_new)                               # [tq, tk] f32
            l_new = alpha * l_prev + jnp.sum(p, axis=-1, keepdims=True)
            pv = jnp.dot(p.astype(v_h.dtype), v_h,
                         preferred_element_type=jnp.float32)     # [tq, D]

            m_scr[:, g:g + 1] = m_new
            l_scr[:, g:g + 1] = l_new
            acc_scr[:, g * head_dim:(g + 1) * head_dim] = alpha * acc_prev + pv

    # Skip KV tiles that are fully masked for this Q tile (causal / SWA).
    need = None
    if causal:
        need = ki * k_tile <= qi * q_tile + (q_tile - 1)
    if sliding_window > 0:
        in_win = ki * k_tile + (k_tile - 1) >= qi * q_tile - sliding_window
        need = in_win if need is None else jnp.logical_and(need, in_win)
    if need is None:
        _process_tile()
    else:
        @pl.when(need)
        def _():
            _process_tile()

    @pl.when(ki == pl.num_programs(2) - 1)
    def _finalize():
        pieces = []
        for g in range(num_q_heads):
            l = l_scr[:, g:g + 1]
            l = jnp.where(l > 0.0, l, 1.0)       # guard fully-masked rows
            inv = pl.reciprocal(l, approx=True)  # EUP slot, ~free
            pieces.append(acc_scr[:, g * head_dim:(g + 1) * head_dim] * inv)
        # single lane-dense store of the whole [tq, Hq*D] tile
        o_ref[0] = jnp.concatenate(pieces, axis=-1).astype(o_ref.dtype)


def flash_attention(q, k, v, *, num_q_heads, num_kv_heads, head_dim,
                    sm_scale, causal, softcap, sliding_window,
                    q_tile_pref=256, k_tile_pref=512):
    """q: [B, S, Hq*D], k/v: [B, S, Hkv*D] -> [B, S, Hq*D] (same dtype as q)."""
    B, S, q_dim = q.shape
    kv_dim = num_kv_heads * head_dim
    assert q_dim == num_q_heads * head_dim and k.shape[-1] == kv_dim
    q_tile = _fit_tile(S, q_tile_pref, 8)
    k_tile = _fit_tile(S, k_tile_pref, 8)
    grid = (B, S // q_tile, S // k_tile)

    kernel = functools.partial(
        _flash_attn_kernel, scale=sm_scale, causal=causal, softcap=softcap,
        sliding_window=sliding_window, num_q_heads=num_q_heads,
        num_kv_heads=num_kv_heads, head_dim=head_dim,
        q_tile=q_tile, k_tile=k_tile)

    itemsize = q.dtype.itemsize
    return pl.pallas_call(
        kernel,
        out_shape=jax.ShapeDtypeStruct((B, S, q_dim), q.dtype),
        grid_spec=pltpu.PrefetchScalarGridSpec(
            num_scalar_prefetch=0,
            grid=grid,
            in_specs=[
                pl.BlockSpec((1, q_tile, q_dim), lambda b, i, j: (b, i, 0)),
                pl.BlockSpec((1, k_tile, kv_dim), lambda b, i, j: (b, j, 0)),
                pl.BlockSpec((1, k_tile, kv_dim), lambda b, i, j: (b, j, 0)),
            ],
            out_specs=pl.BlockSpec((1, q_tile, q_dim), lambda b, i, j: (b, i, 0)),
            scratch_shapes=[
                pltpu.VMEM((q_tile, num_q_heads), jnp.float32),   # running max
                pltpu.VMEM((q_tile, num_q_heads), jnp.float32),   # running sum
                pltpu.VMEM((q_tile, q_dim), jnp.float32),         # accumulator
            ],
        ),
        compiler_params=pltpu.CompilerParams(
            dimension_semantics=("parallel", "parallel", "arbitrary"),
            vmem_limit_bytes=VMEM_LIMIT,
        ),
        cost_estimate=pl.CostEstimate(
            flops=4 * B * num_q_heads * S * S * head_dim,
            transcendentals=B * num_q_heads * S * S,
            bytes_accessed=int((2 * q.size + k.size + v.size) * itemsize),
        ),
    )(q, k, v)


# ------------------------------ JAX glue ops ---------------------------------
# TODO(synk): RMSNorm + RoPE could be fused into the attention-kernel prologue
# (or the projection epilogue) to save one elementwise HBM pass.

def rms_norm(x, w, eps, constant_bias=0.0):
    x32 = x.astype(jnp.float32)
    var = jnp.mean(jnp.square(x32), axis=-1, keepdims=True)
    return x32 * lax.rsqrt(var + eps) * (w.astype(jnp.float32) + constant_bias)


def rope_cos_sin(seqlen, head_dim, theta, position):
    inv_freq = 1.0 / (theta ** (jnp.arange(0, head_dim, 2, dtype=jnp.float32)
                                / head_dim))
    t = jnp.arange(position, position + seqlen, dtype=jnp.float32)
    freqs = jnp.outer(t, inv_freq)                    # [S, D/2]
    emb = jnp.concatenate([freqs, freqs], axis=-1)    # [S, D]
    return jnp.cos(emb), jnp.sin(emb)


def rotate_half(x):
    d = x.shape[-1] // 2
    return jnp.concatenate([-x[..., d:], x[..., :d]], axis=-1)


def apply_rope(x, cos, sin):
    # x: [B, S, H, D]; cos/sin: [S, D]
    cos = cos[None, :, None, :]
    sin = sin[None, :, None, :]
    return x * cos + rotate_half(x) * sin


# --------------------- Attention module forward (flash_attn_nc) --------------

def attention_forward(x, params, cfg):
    B, S, H = x.shape
    hd, Hq, Hkv = cfg["head_dim"], cfg["num_q_heads"], cfg["num_kv_heads"]

    # project_qkv (bf16 MXU operands, weights pre-transposed at load time)
    x2d = x.reshape(B * S, H).astype(jnp.bfloat16)
    q = linear(x2d, params["w_q_t"], jnp.bfloat16)
    k = linear(x2d, params["w_k_t"], jnp.bfloat16)
    v = linear(x2d, params["w_v_t"], jnp.bfloat16)

    # per-head RMSNorm(q,k) + RoPE (f32 math), single bf16 cast afterwards
    q4 = rms_norm(q.reshape(B, S, Hq, hd), params["q_norm_w"],
                  cfg["norm_eps"], cfg["norm_constant_bias"])
    k4 = rms_norm(k.reshape(B, S, Hkv, hd), params["k_norm_w"],
                  cfg["norm_eps"], cfg["norm_constant_bias"])
    cos, sin = rope_cos_sin(S, hd, cfg["rope_theta"], cfg["position"])
    q4 = apply_rope(q4, cos, sin)
    k4 = apply_rope(k4, cos, sin)

    q = q4.reshape(B, S, Hq * hd).astype(jnp.bfloat16)
    k = k4.reshape(B, S, Hkv * hd).astype(jnp.bfloat16)
    v = v.reshape(B, S, Hkv * hd)

    sm_scale = cfg["sm_scale"] if cfg["sm_scale"] is not None else hd ** -0.5
    o = flash_attention(
        q, k, v,
        num_q_heads=Hq, num_kv_heads=Hkv, head_dim=hd,
        sm_scale=sm_scale, causal=cfg["causal"],
        softcap=cfg["logit_softcapping"],
        sliding_window=cfg["sliding_window"])

    # project_o (output kept f32)
    out = linear(o.reshape(B * S, Hq * hd), params["w_o_t"], jnp.float32)
    return out.reshape(B, S, H)


# ------------------------------ pure-JAX reference ---------------------------

def attention_reference(x, params, cfg):
    B, S, H = x.shape
    hd, Hq, Hkv = cfg["head_dim"], cfg["num_q_heads"], cfg["num_kv_heads"]
    f32 = lambda a: a.astype(jnp.float32)
    q16 = lambda a: a.astype(jnp.bfloat16).astype(jnp.float32)  # match kernel casts

    x2d = q16(x.reshape(B * S, H))
    wq, wk, wv, wo = (f32(params[n]) for n in ("w_q_t", "w_k_t", "w_v_t", "w_o_t"))
    q = q16(x2d @ wq).reshape(B, S, Hq, hd)
    k = q16(x2d @ wk).reshape(B, S, Hkv, hd)
    v = q16(x2d @ wv).reshape(B, S, Hkv, hd)
    q = rms_norm(q, params["q_norm_w"], cfg["norm_eps"], cfg["norm_constant_bias"])
    k = rms_norm(k, params["k_norm_w"], cfg["norm_eps"], cfg["norm_constant_bias"])
    cos, sin = rope_cos_sin(S, hd, cfg["rope_theta"], cfg["position"])
    q = q16(apply_rope(q, cos, sin))
    k = q16(apply_rope(k, cos, sin))
    group = Hq // Hkv
    k = jnp.repeat(k, group, axis=2)
    v = jnp.repeat(v, group, axis=2)
    q, k, v = (t.transpose(0, 2, 1, 3) for t in (q, k, v))   # [B, H, S, D]
    sm_scale = cfg["sm_scale"] if cfg["sm_scale"] is not None else hd ** -0.5
    s = jnp.einsum("bhqd,bhkd->bhqk", q, k) * sm_scale
    if cfg["logit_softcapping"] > 0.0:
        s = cfg["logit_softcapping"] * jnp.tanh(s / cfg["logit_softcapping"])
    qi = jnp.arange(S)[:, None]
    ki = jnp.arange(S)[None, :]
    mask = jnp.ones((S, S), dtype=bool)
    if cfg["causal"]:
        mask = mask & (ki <= qi)
    if cfg["sliding_window"] > 0:
        mask = mask & ((qi - ki) <= cfg["sliding_window"])
    s = jnp.where(mask[None, None], s, MASK_VALUE)
    p = jax.nn.softmax(s, axis=-1)
    o = jnp.einsum("bhqk,bhkd->bhqd", p, v)
    o = q16(o.transpose(0, 2, 1, 3).reshape(B * S, Hq * hd))
    return (o @ wo).reshape(B, S, H)


# ----------------------------------- main ------------------------------------

if __name__ == "__main__":
    cfg = dict(
        hidden_size=32,
        head_dim=16,
        num_q_heads=4,
        num_kv_heads=2,          # GQA
        sm_scale=None,           # defaults to head_dim ** -0.5
        sliding_window=-1,       # disabled
        logit_softcapping=0.0,   # disabled
        norm_eps=1e-6,
        norm_constant_bias=0.0,
        rope_theta=10000.0,
        position=0,
        causal=True,
    )
    B, S = 2, 8
    Hq, Hkv, hd, H = (cfg["num_q_heads"], cfg["num_kv_heads"],
                      cfg["head_dim"], cfg["hidden_size"])

    key = jax.random.PRNGKey(0)
    ks = jax.random.split(key, 8)
    # PyTorch nn.Linear layout is (out_features, in_features); transpose ONCE
    # at "load" time to (in, out) and cast to bf16 (no per-forward relayout).
    w_q = jax.random.normal(ks[0], (Hq * hd, H), jnp.float32) * 0.05
    w_k = jax.random.normal(ks[1], (Hkv * hd, H), jnp.float32) * 0.05
    w_v = jax.random.normal(ks[2], (Hkv * hd, H), jnp.float32) * 0.05
    w_o = jax.random.normal(ks[3], (H, Hq * hd), jnp.float32) * 0.05
    params = {
        "w_q_t": w_q.T.astype(jnp.bfloat16),
        "w_k_t": w_k.T.astype(jnp.bfloat16),
        "w_v_t": w_v.T.astype(jnp.bfloat16),
        "w_o_t": w_o.T.astype(jnp.bfloat16),
        "q_norm_w": jnp.ones((hd,), jnp.float32)
                    + 0.01 * jax.random.normal(ks[4], (hd,), jnp.float32),
        "k_norm_w": jnp.ones((hd,), jnp.float32)
                    + 0.01 * jax.random.normal(ks[5], (hd,), jnp.float32),
    }
    x = jax.random.normal(ks[6], (B, S, H), jnp.float32)

    out = jax.block_until_ready(attention_forward(x, params, cfg))
    ref = attention_reference(x, params, cfg)

    assert out.shape == (B, S, H), out.shape
    err = float(jnp.max(jnp.abs(out.astype(jnp.float32) - ref)))
    assert jnp.allclose(out.astype(jnp.float32), ref, rtol=1e-2, atol=1e-2), err

    # TODO(synk): the exl3 quantized trellis GEMM (MultiLinear fused KV proj)
    # and the paged-KV-cache 'flash_attn' / 'sdpa_nc' modes are not reproduced;
    # only the no-cache 'flash_attn_nc' path is implemented.
    print("KERNEL_OK")
</pallas_src>

<mosaic_0001>
module attributes {stable_mosaic.version = 11 : i64} {
  func.func @_linear_kernel(%arg0: i32, %arg1: i32, %arg2: i32, %arg3: memref<16x32xbf16, #tpu.memory_space<vmem>>, %arg4: memref<32x64xbf16, #tpu.memory_space<vmem>>, %arg5: memref<16x64xbf16, #tpu.memory_space<vmem>>, %arg6: memref<16x64xf32, #tpu.memory_space<vmem>>) attributes {dimension_semantics = [#tpu.dimension_semantics<parallel>, #tpu.dimension_semantics<parallel>, #tpu.dimension_semantics<arbitrary>], iteration_bounds = array<i64: 1, 1, 1>, scalar_prefetch = 0 : i64, scratch_operands = 1 : i64, tpu.core_type = #tpu.core_type<tc>, window_params = [{transform_indices = @transform_0, window_bounds = array<i64: 16, 32>}, {transform_indices = @transform_1, window_bounds = array<i64: 32, 64>}, {transform_indices = @transform_2, window_bounds = array<i64: 16, 64>}]} {
    %c0_i32 = arith.constant 0 : i32
    %0 = arith.cmpi eq, %arg2, %c0_i32 : i32
    %1 = arith.extui %0 : i1 to i32
    %c0_i32_0 = arith.constant 0 : i32
    %2 = arith.cmpi ne, %1, %c0_i32_0 : i32
    scf.if %2 {
      %cst_10 = arith.constant 0.000000e+00 : f32
      %12 = vector.broadcast %cst_10 : f32 to vector<16x64xf32>
      %c0_11 = arith.constant 0 : index
      %c0_12 = arith.constant 0 : index
      %13 = vector.load %arg6[%c0_11, %c0_12] : memref<16x64xf32, #tpu.memory_space<vmem>>, vector<16x64xf32>
      tpu.vector_store %arg6[%c0_11, %c0_12], %12 {strides = array<i32>} : memref<16x64xf32, #tpu.memory_space<vmem>>, vector<16x64xf32>,
    } else {
    }
    %c0 = arith.constant 0 : index
    %c0_1 = arith.constant 0 : index
    %3 = vector.load %arg6[%c0, %c0_1] : memref<16x64xf32, #tpu.memory_space<vmem>>, vector<16x64xf32>
    %c0_2 = arith.constant 0 : index
    %c0_3 = arith.constant 0 : index
    %4 = vector.load %arg3[%c0_2, %c0_3] : memref<16x32xbf16, #tpu.memory_space<vmem>>, vector<16x32xbf16>
    %c0_4 = arith.constant 0 : index
    %c0_5 = arith.constant 0 : index
    %5 = vector.load %arg4[%c0_4, %c0_5] : memref<32x64xbf16, #tpu.memory_space<vmem>>, vector<32x64xbf16>
    %cst = arith.constant dense<0.000000e+00> : vector<16x64xf32>
    %6 = tpu.matmul %4, %5, %cst {dimension_numbers = #tpu.dot_dimension_numbers<[1], [0], [0], [1], [0, 0, 1, 1], [], []>} : vector<16x32xbf16>, vector<32x64xbf16>, vector<16x64xf32> -> vector<16x64xf32>
    %7 = arith.addf %3, %6 : vector<16x64xf32>
    %c0_6 = arith.constant 0 : index
    %c0_7 = arith.constant 0 : index
    %8 = vector.load %arg6[%c0_6, %c0_7] : memref<16x64xf32, #tpu.memory_space<vmem>>, vector<16x64xf32>
    tpu.vector_store %arg6[%c0_6, %c0_7], %7 {strides = array<i32>} : memref<16x64xf32, #tpu.memory_space<vmem>>, vector<16x64xf32>,
    %c0_i32_8 = arith.constant 0 : i32
    %9 = arith.cmpi eq, %arg2, %c0_i32_8 : i32
    %10 = arith.extui %9 : i1 to i32
    %c0_i32_9 = arith.constant 0 : i32
    %11 = arith.cmpi ne, %10, %c0_i32_9 : i32
    scf.if %11 {
      %c0_10 = arith.constant 0 : index
      %c0_11 = arith.constant 0 : index
      %12 = vector.load %arg6[%c0_10, %c0_11] : memref<16x64xf32, #tpu.memory_space<vmem>>, vector<16x64xf32>
      %13 = arith.truncf %12 : vector<16x64xf32> to vector<16x64xbf16>
      %c0_12 = arith.constant 0 : index
      %c0_13 = arith.constant 0 : index
      %14 = vector.load %arg5[%c0_12, %c0_13] : memref<16x64xbf16, #tpu.memory_space<vmem>>, vector<16x64xbf16>
      tpu.vector_store %arg5[%c0_12, %c0_13], %13 {strides = array<i32>} : memref<16x64xbf16, #tpu.memory_space<vmem>>, vector<16x64xbf16>,
    } else {
    }
    return
  }
  func.func @transform_0(%arg0: i32, %arg1: i32, %arg2: i32) -> (i32, i32) {
    %c0_i32 = arith.constant 0 : i32
    return %arg0, %arg2 : i32, i32
  }
  func.func @transform_1(%arg0: i32, %arg1: i32, %arg2: i32) -> (i32, i32) {
    %c0_i32 = arith.constant 0 : i32
    return %arg2, %arg1 : i32, i32
  }
  func.func @transform_2(%arg0: i32, %arg1: i32, %arg2: i32) -> (i32, i32) {
    %c0_i32 = arith.constant 0 : i32
    return %arg0, %arg1 : i32, i32
  }
}

</mosaic_0001>

<bundles_post_ra>
// kernel: tpu_custom_call.1
= control target key start
LH: loop header
LB: loop body
LE: loop exit
PB: predicated region body
PF: predicated region fallthrough
CT: control target
= control target key end

     0   :  { %7 = vsyncpa [#allocation4], 0  ;;  %s296_s0 = inlined_call_operand.hbm [shape: bf16[16,32], index: 0, kind: input, shape index: {}]   ;;  %s297_s1 = inlined_call_operand.hbm [shape: bf16[32,64], index: 1, kind: input, shape index: {}]   ;;  %s298_s2 = inlined_call_operand.hbm [shape: bf16[16,64], index: 2, kind: output, shape index: {}]  }
   0x1   :  { %8 = vsyncpa [#allocation7], 0 }
   0x2   :  { %9 = vsyncpa [#allocation5], 0  ;;  %s252_s9 = smov [#allocation3]  }
   0x3   :  { %s15_s10 = sshll.u32 %s252_s9, 4  ;;  %s16_s10 = int_to_ptr.vmem [resolvable:$true] %s15_s10 }
   0x4   :  { %s194_s11 = scalar_lea.vmem %s16_s10, 128  ;;  %p199_p1 = scmp.lt.s32.totalorder %s16_s10, %s16_s10 }
   0x5   :  { %p195_p0 = scmp.ne.s32.totalorder %s16_s10, %s194_s11  ;;  %p200_p2 = scmp.lt.s32.totalorder %s194_s11, %s194_s11 }
   0x7   :  { %p201_p3 = por %p200_p2, %p199_p1 }
   0x9   :  { %p202_p4 = pnand %p201_p3, %p195_p0 }
   0xb   :  { %205 = shalt.err (!%p202_p4)
}
   0xc   :  { %s253_s12 = smov 64   ;;  %s254_s13 = smov 4  }
   0xd   :  { %21 = dma.hbm_to_vmem [thread:$0]  %s296_s0, 128, %s16_s10, [#allocation4], %s253_s12, %s253_s12, %s254_s13  }
   0xe   :  { %s255_s16 = smov [#allocation6]  }
   0xf   :  { %s27_s17 = sshll.u32 %s255_s16, 4  ;;  %s28_s17 = int_to_ptr.vmem [resolvable:$true] %s27_s17 }
  0x10   :  { %s214_s18 = scalar_lea.vmem %s28_s17, 256  ;;  %p219_p6 = scmp.lt.s32.totalorder %s28_s17, %s28_s17 }
  0x11   :  { %p215_p5 = scmp.ne.s32.totalorder %s28_s17, %s214_s18  ;;  %p220_p7 = scmp.lt.s32.totalorder %s214_s18, %s214_s18 }
  0x13   :  { %p221_p8 = por %p220_p7, %p219_p6 }
  0x15   :  { %p222_p9 = pnand %p221_p8, %p215_p5 }
  0x17   :  { %225 = shalt.err (!%p222_p9)
}
  0x18   :  { %33 = dma.hbm_to_vmem [thread:$0]  %s297_s1, 256, %s28_s17, [#allocation7], %s253_s12, %s253_s12, %s254_s13  }
  0x19   :  { %246 = dma.done.wait [#allocation4], 128  }
  0x1a   :  { %247 = vsyncadd [#allocation4], 4294967168 }
  0x1b   :  { %248 = dma.done.wait [#allocation7], 256  }
  0x1c   :  { %249 = vsyncadd [#allocation7], 4294967040  ;;  %vm45_vm0 = vcmask 523264   ;;  %v256_v0 = vmov 0.0   ;;  %vm257_vm1 = vmmov 0   ;;  %v183_v1 = vld [vmem:[#allocation6 + $0x8] sm:$0xff]  }
  0x1d   :  { %46 = vst.msk [vmem:[#allocation2] sm:$0xff] %vm45_vm0, %v256_v0  ;;  %47 = vst.msk [vmem:[#allocation2 + $0x8] sm:$0xff] %vm45_vm0, %v256_v0  ;;  %168 = vmatprep.subr.bf16.mxu0 %v256_v0  ;;  %172 = vmatprep.mubr.msk.bf16.mxu0 %vm257_vm1, %v256_v0  ;;  %v184_v2 = vld [vmem:[#allocation6] sm:$0xff]   ;;  %v185_v3 = vld [vmem:[#allocation3] sm:$0xff]   ;;  %vm73_vm2 = vcmask 261120   ;;  %vm136_vm3 = vcmask 519168  }
  0x1e   :  { %169 = vmatpush3.bf16.msra.mxu0 %v183_v1  ;;  %s258_s0 = smov [#allocation8]  }
  0x1f   :  { %170 = vmatprep.subr.bf16.mxu0 %v256_v0  ;;  %s144_s1 = sshll.u32 %s258_s0, 4  ;;  %s145_s1 = int_to_ptr.vmem [resolvable:$true] %s144_s1 }
  0x20   :  { %s226_s21 = scalar_lea.vmem %s145_s1, 128  ;;  %p231_p11 = scmp.lt.s32.totalorder %s145_s1, %s145_s1 }
  0x21   :  { %p227_p10 = scmp.ne.s32.totalorder %s145_s1, %s226_s21  ;;  %p232_p12 = scmp.lt.s32.totalorder %s226_s21, %s226_s21 }
  0x22   :  { %171 = vmatpush3.bf16.msra.mxu0 %v184_v2 }
  0x23   :  { %p233_p13 = por %p232_p12, %p231_p11 }
  0x24   :  { %v48_v4 = vld [vmem:[#allocation2] sm:$0xff]  ;;  %v49_v8 = vld [vmem:[#allocation2 + $0x8] sm:$0xff] }
  0x25   :  { %173 = vmatmul.mubr.msk.bf16.vlgmr.msra.gmra.mxu0 %vm73_vm2, %v185_v3  ;;  %p234_p0 = pnand %p233_p13, %p227_p10 }
  0xe5   :  { %v111_v5 = vpop.f32.mrf.mxu0 }
  0xe6   :  { %v118_v6 = vadd.f32 %v111_v5, %v48_v4 }
  0xe7   :  { %v174_v7 = vpop.f32.mrf.mxu0 }
  0xe8   :  { %121 = vst.msk [vmem:[#allocation2] sm:$0xff] %vm45_vm0, %v118_v6 }
  0xe9   :  { %v114_v9 = vpop.f32.mrf.mxu0 }
  0xea   :  { %v119_v10 = vadd.f32 %v114_v9, %v49_v8 }
  0xeb   :  { %v175_v11 = vpop.f32.mrf.mxu0 }
  0xec   :  { %122 = vst.msk [vmem:[#allocation2 + $0x8] sm:$0xff] %vm45_vm0, %v119_v10 }
  0xef   :  { %v126_v12 = vld [vmem:[#allocation2] sm:$0xff] }
  0xf0   :  { %v163_v13 = vpack.c.bf16 %v126_v12, %v126_v12 }
  0xf2   :  { %137 = vst.msk [vmem:[#allocation8] sm:$0xf] %vm136_vm3, %v163_v13 }
  0xf3   :  { %v127_v14 = vld [vmem:[#allocation2 + $0x8] sm:$0xff] }
  0xf4   :  { %v164_v15 = vpack.c.bf16 %v127_v14, %v127_v14 }
  0xf6   :  { %138 = vst.msk [vmem:[#allocation8 + $0x4] sm:$0xf] %vm136_vm3, %v164_v15 }
  0xf7   :  { %237 = shalt.err (!%p234_p0)
}
  0xf8   :  { %150 = dma.vmem_to_hbm [thread:$0]  %s145_s1, 128, %s298_s2, [#allocation5], %s253_s12, %s253_s12, %s254_s13  }
  0xf9   :  { %250 = dma.done.wait [#allocation5], 128  }
  0xfa   :  { %251 = vsyncadd [#allocation5], 4294967168 }
  0xfb   :  { %154 = vsyncpa [#allocation4], 1 }
  0xfc   :  { %155 = vsyncpa [#allocation7], 1 }
  0xfd   :  { %156 = vsyncpa [#allocation5], 1 }

</bundles_post_ra>
